<compile_context>
chip_gen: v6e
topology: v6e:2x2x1
jax: 0.10.0
libtpu: 0.0.40
codegen_flags: <defaults>
</compile_context>

<pallas_src>
import functools

import jax
import jax.numpy as jnp
from jax.experimental import pallas as pl
from jax.experimental.pallas import tpu as pltpu


def _mf_dr_kernel(u_ref, v_ref, out_ref):
    # u_ref / v_ref : (K, TB)  -- K in sublanes, batch in lanes (lane-dense)
    # out_ref       : (1, TB)  -- lane-dense output row
    u = u_ref[...].astype(jnp.float32)
    v = v_ref[...].astype(jnp.float32)
    out_ref[...] = jnp.sum(u * v, axis=0, keepdims=True)


def _round_up(x, m):
    return ((x + m - 1) // m) * m


def mf_dr_prepare_tables(W, H):
    """Pre-transpose the embedding tables ONCE: (N, K) -> (K, N)."""
    return W.T, H.T


@functools.partial(jax.jit, static_argnames=("is_training", "tb"))
def mf_dr_forward_t(x, W_T, H_T, is_training=False, tb=4096):
    """MF_DR.forward with pre-transposed tables W_T:(K,U), H_T:(K,I)."""
    user_idx = x[:, 0]
    item_idx = x[:, 1]

    B = x.shape[0]
    K = W_T.shape[0]

    # Batch tile: multiple of 128 lanes, capped at `tb`, no wild over-padding
    # for tiny batches.  tb default 4096 amortizes the ~0.35us/step pipeline
    # overhead on this purely memory-bound kernel; VMEM use stays < 1 MiB.
    tb_eff = max(128, min(tb, _round_up(B, 128)))
    Bp = _round_up(B, tb_eff)
    pad = Bp - B

    # Pad the *indices* (cheap) instead of the gathered [B, K] arrays.
    ui = jnp.pad(user_idx, (0, pad))
    vi = jnp.pad(item_idx, (0, pad))

    # Lane-dense gathers straight from the pre-transposed tables -> (K, Bp).
    # No (Bp, K) activation transpose, no f32 upcast before the kernel.
    uT = jnp.take(W_T, ui, axis=1)   # (K, Bp), table dtype
    vT = jnp.take(H_T, vi, axis=1)   # (K, Bp), table dtype

    # NOTE: default double-buffering is sufficient at TB>=2048; if DMA latency
    # is still exposed on a profile, add pipeline_mode=pl.Buffered(3) here.
    emb_spec = pl.BlockSpec((K, tb_eff), lambda i: (0, i))
    out_spec = pl.BlockSpec((1, tb_eff), lambda i: (0, i))

    out2d = pl.pallas_call(
        _mf_dr_kernel,
        out_shape=jax.ShapeDtypeStruct((1, Bp), jnp.float32),
        grid_spec=pltpu.PrefetchScalarGridSpec(
            num_scalar_prefetch=0,
            grid=(Bp // tb_eff,),
            in_specs=[emb_spec, emb_spec],
            out_specs=out_spec,
        ),
        compiler_params=pltpu.CompilerParams(
            dimension_semantics=("parallel",),
            vmem_limit_bytes=32 * 1024 * 1024,
        ),
    )(uT, vT)

    out = out2d[0, :B]

    if is_training:
        # PyTorch returns (B, K) embeddings; only the training path pays this
        # small (B x K) relayout.
        return out, uT[:, :B].T, vT[:, :B].T
    return out


def mf_dr_forward(x, W, H, is_training=False, tb=4096):
    """Convenience wrapper taking row-major tables W:(U,K), H:(I,K).

    For large tables, call mf_dr_prepare_tables once and use mf_dr_forward_t
    directly to avoid a per-call table transpose.
    """
    W_T, H_T = mf_dr_prepare_tables(W, H)
    return mf_dr_forward_t(x, W_T, H_T, is_training=is_training, tb=tb)


def _reference_forward(x, W, H):
    """Pure-JAX reference mirroring the PyTorch forward (is_training=True)."""
    ui, vi = x[:, 0], x[:, 1]
    U = W[ui]
    V = H[vi]
    out = jnp.sum(U * V, axis=1)
    return out, U, V


if __name__ == "__main__":
    num_users = 10
    num_items = 12
    embedding_k = 4
    batch = 8

    key = jax.random.PRNGKey(0)
    k1, k2, k3, k4 = jax.random.split(key, 4)

    # nn.Embedding default init ~ N(0, 1).
    W = jax.random.normal(k1, (num_users, embedding_k), jnp.float32)
    H = jax.random.normal(k2, (num_items, embedding_k), jnp.float32)

    user_idx = jax.random.randint(k3, (batch,), 0, num_users)
    item_idx = jax.random.randint(k4, (batch,), 0, num_items)
    x = jnp.stack([user_idx, item_idx], axis=1)  # (B, 2) int32

    W_T, H_T = mf_dr_prepare_tables(W, H)

    # Inference path (is_training=False) -> out only.
    out = mf_dr_forward_t(x, W_T, H_T, is_training=False)
    out = jax.block_until_ready(out)

    # Training path -> (out, U_emb, V_emb).
    out_t, U_emb, V_emb = mf_dr_forward_t(x, W_T, H_T, is_training=True)
    jax.block_until_ready(out_t)

    ref_out, ref_U, ref_V = _reference_forward(x, W, H)

    assert jnp.allclose(out, ref_out, atol=1e-5), "out mismatch"
    assert jnp.allclose(out_t, ref_out, atol=1e-5), "training out mismatch"
    assert jnp.allclose(U_emb, ref_U, atol=1e-6), "U_emb mismatch"
    assert jnp.allclose(V_emb, ref_V, atol=1e-6), "V_emb mismatch"

    # Second check: batch that is not a multiple of the lane tile and that
    # exercises a multi-step grid (tb=128 -> 3 grid steps).
    kb1, kb2 = jax.random.split(k3)
    ui2 = jax.random.randint(kb1, (300,), 0, num_users)
    vi2 = jax.random.randint(kb2, (300,), 0, num_items)
    x2 = jnp.stack([ui2, vi2], axis=1)
    out2 = jax.block_until_ready(mf_dr_forward_t(x2, W_T, H_T, tb=128))
    ref2, _, _ = _reference_forward(x2, W, H)
    assert jnp.allclose(out2, ref2, atol=1e-5), "multi-tile out mismatch"

    print("KERNEL_OK")
</pallas_src>

<mosaic_0001>
module attributes {stable_mosaic.version = 11 : i64} {
  func.func @_mf_dr_kernel(%arg0: i32, %arg1: memref<4x128xf32, #tpu.memory_space<vmem>>, %arg2: memref<4x128xf32, #tpu.memory_space<vmem>>, %arg3: memref<1x128xf32, #tpu.memory_space<vmem>>) attributes {dimension_semantics = [#tpu.dimension_semantics<parallel>], iteration_bounds = array<i64: 1>, scalar_prefetch = 0 : i64, scratch_operands = 0 : i64, tpu.core_type = #tpu.core_type<tc>, window_params = [{transform_indices = @transform_0, window_bounds = array<i64: 4, 128>}, {transform_indices = @transform_1, window_bounds = array<i64: 4, 128>}, {transform_indices = @transform_2, window_bounds = array<i64: 1, 128>}]} {
    %c0 = arith.constant 0 : index
    %c0_0 = arith.constant 0 : index
    %0 = vector.load %arg1[%c0, %c0_0] : memref<4x128xf32, #tpu.memory_space<vmem>>, vector<4x128xf32>
    %c0_1 = arith.constant 0 : index
    %c0_2 = arith.constant 0 : index
    %1 = vector.load %arg2[%c0_1, %c0_2] : memref<4x128xf32, #tpu.memory_space<vmem>>, vector<4x128xf32>
    %2 = arith.mulf %0, %1 : vector<4x128xf32>
    %cst = arith.constant dense<0.000000e+00> : vector<128xf32>
    %3 = vector.multi_reduction <add>, %2, %cst [0] : vector<4x128xf32> to vector<128xf32>
    %4 = vector.shape_cast %3 : vector<128xf32> to vector<1x128xf32>
    %c0_3 = arith.constant 0 : index
    %c0_4 = arith.constant 0 : index
    %5 = vector.load %arg3[%c0_3, %c0_4] : memref<1x128xf32, #tpu.memory_space<vmem>>, vector<1x128xf32>
    tpu.vector_store %arg3[%c0_3, %c0_4], %4 {strides = array<i32>} : memref<1x128xf32, #tpu.memory_space<vmem>>, vector<1x128xf32>,
    return
  }
  func.func @transform_0(%arg0: i32) -> (i32, i32) {
    %c0_i32 = arith.constant 0 : i32
    %c0_i32_0 = arith.constant 0 : i32
    return %c0_i32, %arg0 : i32, i32
  }
  func.func @transform_1(%arg0: i32) -> (i32, i32) {
    %c0_i32 = arith.constant 0 : i32
    %c0_i32_0 = arith.constant 0 : i32
    return %c0_i32, %arg0 : i32, i32
  }
  func.func @transform_2(%arg0: i32) -> (i32, i32) {
    %c0_i32 = arith.constant 0 : i32
    %c0_i32_0 = arith.constant 0 : i32
    return %c0_i32, %arg0 : i32, i32
  }
}

</mosaic_0001>

<bundles_post_ra>
// kernel: mf_dr_forward_t.1
= control target key start
LH: loop header
LB: loop body
LE: loop exit
PB: predicated region body
PF: predicated region fallthrough
CT: control target
= control target key end

     0   :  { %vm14_vm0 = vcmask 1043456   ;;  %s51_s0 = inlined_call_operand.vmem [shape: f32[4,128], index: 0, kind: input, shape index: {}]   ;;  %s52_s1 = inlined_call_operand.vmem [shape: f32[4,128], index: 1, kind: input, shape index: {}]   ;;  %s53_s2 = inlined_call_operand.vmem [shape: f32[1,128], index: 2, kind: output, shape index: {}]  }
   0x1   :  { %v11_v0 = vld [vmem:[%s51_s0] sm:$0xf] }
   0x2   :  { %v12_v1 = vld [vmem:[%s52_s1] sm:$0xf] }
   0x3   :  { %v13_v2 = vmul.f32 %v12_v1, %v11_v0 }
   0x5   :  { %v15_v3 = vsel %vm14_vm0, %v13_v2, 0.0 }
   0x6   :  { %v16_v4 = vrot.slane %v15_v3, 4 }
   0x8   :  { %v17_v5 = vadd.f32 %v16_v4, %v15_v3 }
   0xa   :  { %v18_v6 = vrot.slane %v17_v5, 2 }
   0xc   :  { %v19_v7 = vadd.f32 %v18_v6, %v17_v5 }
   0xe   :  { %v20_v8 = vrot.slane %v19_v7, 1 }
  0x10   :  { %v21_v9 = vadd.f32 %v20_v8, %v19_v7 }
  0x12   :  { %22 = vst [vmem:[%s53_s2] sm:$0x1] %v21_v9 }

</bundles_post_ra>
